<compile_context>
chip_gen: v5e
topology: v5e:2x2
jax: 0.10.0
libtpu: 0.0.40
codegen_flags: <defaults>
</compile_context>

<pallas_src>
import math

import jax
import jax.numpy as jnp
from jax.experimental import pallas as pl
from jax.experimental.pallas import tpu as pltpu


def _cat_kernel(g_ref, h_ref, o_ref):
    # Two whole-tile lane-range stores.  Any dtype promotion is done here on
    # the VPU (fully hidden under the HBM DMAs) rather than as a wrapper-side
    # XLA cast that would cost an extra HBM pass over that operand.
    d1 = g_ref.shape[-1]
    o_ref[:, :d1] = g_ref[...].astype(o_ref.dtype)
    o_ref[:, d1:] = h_ref[...].astype(o_ref.dtype)


def _sublane_multiple(dtype) -> int:
    # Sub-32-bit dtypes pack along sublanes: f32 -> 8, bf16 -> 16, int8/fp8 -> 32.
    itemsize = jnp.dtype(dtype).itemsize
    return {4: 8, 2: 16, 1: 32}.get(itemsize, 8)


def _round_up(x: int, m: int) -> int:
    return ((x + m - 1) // m) * m


def cat_fusion(g_embed: jax.Array, h_embed: jax.Array) -> jax.Array:
    """Equivalent of torch.cat((g_embed, h_embed), dim=-1)."""
    assert g_embed.shape[:-1] == h_embed.shape[:-1], "leading dims must match"

    out_dtype = jnp.result_type(g_embed.dtype, h_embed.dtype)
    lead = g_embed.shape[:-1]
    d1 = g_embed.shape[-1]
    d2 = h_embed.shape[-1]
    d_out = d1 + d2
    rows = int(math.prod(lead)) if lead else 1

    # Degenerate shapes: don't try to lower zero-sized blocks.
    if rows == 0 or d_out == 0:
        return jnp.zeros((*lead, d_out), out_dtype)
    if d1 == 0:
        return h_embed.astype(out_dtype)
    if d2 == 0:
        return g_embed.astype(out_dtype)

    g2 = g_embed.reshape(rows, d1)
    h2 = h_embed.reshape(rows, d2)

    g_item = jnp.dtype(g_embed.dtype).itemsize
    h_item = jnp.dtype(h_embed.dtype).itemsize
    o_item = jnp.dtype(out_dtype).itemsize

    # Row tiles must satisfy every operand's sublane packing (8/16/32 are
    # nested multiples, so max == lcm).
    sub = max(_sublane_multiple(dt)
              for dt in (g_embed.dtype, h_embed.dtype, out_dtype))

    # Generation-dependent VMEM sizing: big tiles on 128 MiB chips (v5e/v6e),
    # conservative on v7x's 64 MiB per TensorCore (and on unknown chips).
    try:
        vmem_cap = int(pltpu.get_tpu_info().vmem_capacity_bytes)
    except Exception:  # no TPU info available at trace time -> be conservative
        vmem_cap = 64 * 1024 * 1024
    if vmem_cap >= 100 * 1024 * 1024:      # v5e / v6e: 128 MiB physical VMEM
        vmem_budget = 48 * 1024 * 1024
        vmem_limit = 64 * 1024 * 1024
    else:                                   # v7x (64 MiB per TC) or unknown
        vmem_budget = 24 * 1024 * 1024
        vmem_limit = 48 * 1024 * 1024

    # Double-buffered per-step footprint = 2 * tile_rows * bytes_per_row.
    bytes_per_row = d1 * g_item + d2 * h_item + d_out * o_item
    max_rows = max(vmem_budget // (2 * bytes_per_row), sub)
    tile_rows = (max_rows // sub) * sub

    # Never collapse to a single block when there are enough rows: target ~8
    # blocks so the software pipeline overlaps reads/writes and v7x's two
    # TensorCores both get work on the "parallel" row axis.
    target_blocks = 8
    cap = max(sub, _round_up(pl.cdiv(rows, target_blocks), sub))
    tile_rows = min(tile_rows, cap)

    if tile_rows >= rows:
        # Full extent along rows is always a legal block shape (tiny inputs).
        tile_rows = rows
        num_blocks = 1
    else:
        num_blocks = pl.cdiv(rows, tile_rows)
        # Prefer an even block count so the row axis shards evenly across
        # v7x's two TensorCores (bounded adjustment; shrinking tile_rows only
        # adds blocks, never breaks correctness — last block is masked).
        tries = 0
        while num_blocks % 2 == 1 and tile_rows > sub and tries < 16:
            tile_rows -= sub
            num_blocks = pl.cdiv(rows, tile_rows)
            tries += 1

    grid = (num_blocks,)

    # Pure bandwidth op: read g + h at their native itemsizes, write out.
    bytes_accessed = (g2.size * g_item + h2.size * h_item
                      + rows * d_out * o_item)
    cost = pl.CostEstimate(flops=0, transcendentals=0,
                           bytes_accessed=bytes_accessed)

    out2 = pl.pallas_call(
        _cat_kernel,
        out_shape=jax.ShapeDtypeStruct((rows, d_out), out_dtype),
        grid=grid,
        in_specs=[
            pl.BlockSpec((tile_rows, d1), lambda i: (i, 0)),
            pl.BlockSpec((tile_rows, d2), lambda i: (i, 0)),
        ],
        out_specs=pl.BlockSpec((tile_rows, d_out), lambda i: (i, 0)),
        compiler_params=pltpu.CompilerParams(
            dimension_semantics=("parallel",),
            vmem_limit_bytes=vmem_limit,
        ),
        cost_estimate=cost,
    )(g2, h2)

    return out2.reshape(*lead, d_out)


if __name__ == "__main__":
    key = jax.random.PRNGKey(0)
    kg, kh, kg2, kh2 = jax.random.split(key, 4)

    # Primary test: batch=2, seq=8, hidden=32 each (matches the module demo).
    g_embed = jax.random.normal(kg, (2, 8, 32), dtype=jnp.float32)
    h_embed = jax.random.normal(kh, (2, 8, 32), dtype=jnp.float32)
    out = jax.block_until_ready(cat_fusion(g_embed, h_embed))
    ref = jnp.concatenate([g_embed, h_embed], axis=-1)
    assert out.shape == (2, 8, 64), out.shape
    assert jnp.array_equal(out, ref), "mismatch vs jnp.concatenate reference"

    # Secondary test: ragged row count (rows % tile_rows != 0) and mixed
    # dtypes — exercises the masked last row block and the in-kernel cast.
    g_b = jax.random.normal(kg2, (2, 9, 32), dtype=jnp.float32)
    h_b = jax.random.normal(kh2, (2, 9, 48), dtype=jnp.bfloat16)
    out_b = jax.block_until_ready(cat_fusion(g_b, h_b))
    ref_b = jnp.concatenate([g_b, h_b.astype(jnp.float32)], axis=-1)
    assert out_b.shape == (2, 9, 80), out_b.shape
    assert jnp.array_equal(out_b, ref_b), "mixed-dtype / ragged mismatch"

    print("KERNEL_OK")
</pallas_src>

<mosaic_0001>
module attributes {stable_mosaic.version = 11 : i64} {
  func.func @_cat_kernel(%arg0: i32, %arg1: memref<8x32xf32, #tpu.memory_space<vmem>>, %arg2: memref<8x32xf32, #tpu.memory_space<vmem>>, %arg3: memref<8x64xf32, #tpu.memory_space<vmem>>) attributes {dimension_semantics = [#tpu.dimension_semantics<parallel>], iteration_bounds = array<i64: 2>, scalar_prefetch = 0 : i64, scratch_operands = 0 : i64, tpu.core_type = #tpu.core_type<tc>, window_params = [{transform_indices = @transform_0, window_bounds = array<i64: 8, 32>}, {transform_indices = @transform_1, window_bounds = array<i64: 8, 32>}, {transform_indices = @transform_2, window_bounds = array<i64: 8, 64>}]} {
    %c0 = arith.constant 0 : index
    %c0_0 = arith.constant 0 : index
    %0 = vector.load %arg1[%c0, %c0_0] : memref<8x32xf32, #tpu.memory_space<vmem>>, vector<8x32xf32>
    %c0_1 = arith.constant 0 : index
    %c0_2 = arith.constant 0 : index
    %1 = vector.load %arg3[%c0_1, %c0_2] : memref<8x64xf32, #tpu.memory_space<vmem>>, vector<8x32xf32>
    tpu.vector_store %arg3[%c0_1, %c0_2], %0 {strides = array<i32>} : memref<8x64xf32, #tpu.memory_space<vmem>>, vector<8x32xf32>,
    %c0_3 = arith.constant 0 : index
    %c0_4 = arith.constant 0 : index
    %2 = vector.load %arg2[%c0_3, %c0_4] : memref<8x32xf32, #tpu.memory_space<vmem>>, vector<8x32xf32>
    %c0_5 = arith.constant 0 : index
    %c32 = arith.constant 32 : index
    %3 = vector.load %arg3[%c0_5, %c32] : memref<8x64xf32, #tpu.memory_space<vmem>>, vector<8x32xf32>
    tpu.vector_store %arg3[%c0_5, %c32], %2 {strides = array<i32>} : memref<8x64xf32, #tpu.memory_space<vmem>>, vector<8x32xf32>,
    return
  }
  func.func @transform_0(%arg0: i32) -> (i32, i32) {
    %c0_i32 = arith.constant 0 : i32
    %c0_i32_0 = arith.constant 0 : i32
    return %arg0, %c0_i32 : i32, i32
  }
  func.func @transform_1(%arg0: i32) -> (i32, i32) {
    %c0_i32 = arith.constant 0 : i32
    %c0_i32_0 = arith.constant 0 : i32
    return %arg0, %c0_i32 : i32, i32
  }
  func.func @transform_2(%arg0: i32) -> (i32, i32) {
    %c0_i32 = arith.constant 0 : i32
    %c0_i32_0 = arith.constant 0 : i32
    return %arg0, %c0_i32 : i32, i32
  }
}

</mosaic_0001>

<bundles_post_ra>
// kernel: tpu_custom_call.1
= control target key start
LH: loop header
LB: loop body
LE: loop exit
PB: predicated region body
PF: predicated region fallthrough
CT: control target
= control target key end

     0   :  { %7 = vsyncpa [#allocation3], 0  ;;  %s694_s0 = inlined_call_operand.hbm [shape: f32[16,32], index: 0, kind: input, shape index: {}]   ;;  %s695_s1 = inlined_call_operand.hbm [shape: f32[16,32], index: 1, kind: input, shape index: {}]   ;;  %s696_s2 = inlined_call_operand.hbm [shape: f32[16,64], index: 2, kind: output, shape index: {}]  }
   0x1   :  { %9 = vsyncpa [#allocation3 + $0x1], 0 }
   0x2   :  { %10 = vsyncpa [#allocation6], 0 }
   0x3   :  { %12 = vsyncpa [#allocation6 + $0x1], 0 }
   0x4   :  { %13 = vsyncpa [#allocation4], 0 }
   0x5   :  { %15 = vsyncpa [#allocation4 + $0x1], 0  ;;  %s534_s9 = smov 0   ;;  %s536_s10 = smov 0  }
   0x6   :  { %s538_s11 = smov 0   ;;  %s540_s12 = smov 0  }
   0x7 LB: > { %s555_s13 = sadd.s32 4294967295, %s516_s12   ;;  %s319_s14 = sadd.s32 4294967294, %s516_s12   ;;  %s516_s12 = sphi %s540_s12, %s707_s12   ;;  %s512_s11 = sphi %s538_s11, %s706_s11   ;;  %s508_s10 = sphi %s536_s10, %s705_s10   ;;  %s504_s9 = sphi %s534_s9, %s704_s9  }
   0x8   : > { %s559_s15 = sadd.s32 1, %s516_s12   ;;  %s28_s16 = sadd.s32 1, %s512_s11 }
   0x9   : > { %s25_s17 = ssub.s32 %s516_s12, %s559_s15  ;;  %p35_p0 = scmp.ne.s32.totalorder %s512_s11, %s508_s10 }
   0xa   : > { %p26_p1 = scmp.eq.s32.totalorder %s25_s17, 0  ;;  %p36_p2 = scmp.eq.s32.totalorder %s516_s12, 0 }
   0xb   : > { %p41_p3 = scmp.ne.s32.totalorder %s508_s10, %s504_s9  ;;  %p42_p4 = scmp.eq.s32.totalorder %s555_s13, 0 }
   0xc   : > { %s571_s18 = scalar_select %p26_p1, %s512_s11, %s28_s16  }
   0xd   : > { %p573_p5 = por %p36_p2, %p35_p0  ;;  %p577_p6 = por %p42_p4, %p41_p3 }
   0xe   : > { %p91_p7 = scmp.eq.s32.totalorder %s555_s13, 1  ;;  %p97_p8 = scmp.eq.s32.totalorder %s319_s14, 1 }
   0xf   : > { %p351_p10 = scmp.lt.s32.totalorder %s516_s12, 2  ;;  %s593_s23 = sand.u32 1, %s512_s11  }
  0x10   : > { %p584_p11 = por %p91_p7, %p35_p0  ;;  %p588_p12 = por %p97_p8, %p41_p3 }
  0x11   : > { %s323_s24 = sshll.u32 %s516_s12, 3  ;;  %s322_s25 = sshll.u32 %s593_s23, 3 }
  0x12   : > { %s125_s28 = scalar_lea.hbm %s694_s0, %s323_s24  ;;  %s121_s30 = scalar_lea.vmem [#allocation2], %s322_s25 }
  0x13   : > { %s127_s29 = sshll.u32 %s125_s28, 4  ;;  %s129_s3 = sshll.u32 %s121_s30, 4  ;;  %s128_s29 = int_to_ptr.hbm [resolvable:$true] %s127_s29  ;;  %s130_s3 = int_to_ptr.vmem [resolvable:$true] %s129_s3 }
  0x14   : > { %p602_p13 = pnand %p351_p10, %p573_p5  ;;  %p326_p0 = scmp.ge.s32.totalorder %s516_s12, 1 }
  0x15   : > { %p153_p1 = scmp.lt.s32.totalorder %s516_s12, 3  ;;  %s118_s5 = scalar_lea.sflag [#allocation3], %s593_s23 }
  0x16   : > { %s386_s6 = sshra.s32 %s128_s29, 4  ;;  %p390_p3 = pneg %p602_p13  ;;  %s387_s6 = int_to_ptr.hbm [resolvable:$true] %s386_s6 }
  0x17   : > { %s388_s7 = scalar_lea.hbm %s387_s6, 8  ;;  %s393_s16 = scalar_lea.hbm %s694_s0, 16 }
  0x18   : > { %p389_p2 = scmp.ne.s32.totalorder %s387_s6, %s388_s7  ;;  %p394_p5 = scmp.lt.s32.totalorder %s387_s6, %s694_s0 }
  0x19   : > { %p395_p8 = scmp.lt.s32.totalorder %s393_s16, %s388_s7 }
  0x1a   : > { %p391_p4 = pnand %p390_p3, %p389_p2 }
  0x1b   : > { %p396_p10 = por %p395_p8, %p394_p5 }
  0x1c   : > { %p392_p7 = pneg %p391_p4 }
  0x1e   : > { %p397_p9 = pnand %p396_p10, %p392_p7 }
  0x20   : > { %400 = shalt.err (!%p397_p9)
}
  0x21   : > { %343 = dma.hbm_to_vmem [thread:$0]  (!%p602_p13), %s128_s29, 128, %s130_s3, %s118_s5  }
  0x22   : > { %p626_p2 = pnand %p326_p0, %p153_p1  ;;  %s144_s30 = scalar_lea.hbm %s695_s1, %s323_s24 }
  0x23   : > { %s146_s6 = sshll.u32 %s144_s30, 4  ;;  %s140_s7 = scalar_lea.vmem [#allocation5], %s322_s25  ;;  %s147_s6 = int_to_ptr.hbm [resolvable:$true] %s146_s6 }
  0x24   : > { %s148_s8 = sshll.u32 %s140_s7, 4  ;;  %s137_s14 = scalar_lea.sflag [#allocation6], %s593_s23  ;;  %s149_s8 = int_to_ptr.vmem [resolvable:$true] %s148_s8 }
  0x25   : > { %s416_s16 = sshra.s32 %s147_s6, 4  ;;  %s423_s5 = scalar_lea.hbm %s695_s1, 16  ;;  %s417_s16 = int_to_ptr.hbm [resolvable:$true] %s416_s16 }
  0x26   : > { %s418_s17 = scalar_lea.hbm %s417_s16, 8  ;;  %p424_p4 = scmp.lt.s32.totalorder %s417_s16, %s695_s1 }
  0x27   : > { %p419_p9 = scmp.ne.s32.totalorder %s417_s16, %s418_s17  ;;  %p425_p7 = scmp.lt.s32.totalorder %s423_s5, %s418_s17 }
  0x29   : > { %p421_p0 = pnand %p419_p9, %p390_p3  ;;  %p426_p5 = por %p425_p7, %p424_p4 }
  0x2b   : > { %p422_p1 = pneg %p421_p0 }
  0x2d   : > { %p427_p8 = pnand %p426_p5, %p422_p1 }
  0x2f   : > { %430 = shalt.err (!%p427_p8)
}
  0x30   : > { %346 = dma.hbm_to_vmem [thread:$0]  (!%p602_p13), %s147_s6, 128, %s149_s8, %s137_s14  }
  0x31   : > { %157 = sbr.rel (%p626_p2) target bundleno = 176 (0xb0), region = 28  ;;  %s648_s23 = sand.u32 (!%p626_p2), 1, %s508_s10  }
  0x32   : > { %s327_s25 = sshll.u32 (!%p626_p2), %s648_s23, 3  ;;  %s160_s27 = scalar_lea.sflag (!%p626_p2), [#allocation3], %s648_s23 }
  0x33   : > { %s163_s28 = scalar_lea.vmem (!%p626_p2), [#allocation2], %s327_s25 }
  0x36   : > { %491 = dma.done.wait (%p577_p6), %s160_s27, 128  }
  0x37   : > { %493 = vsyncadd (%p577_p6), %s160_s27, 4294967168  ;;  %s170_s4 = scalar_lea.sflag [#allocation6], %s648_s23  ;;  %s173_s30 = scalar_lea.vmem [#allocation5], %s327_s25 }
  0x38   : > { %495 = dma.done.wait (%p577_p6), %s170_s4, 128  }
  0x39   : > { %497 = vsyncadd (%p577_p6), %s170_s4, 4294967168  ;;  %vm201_vm0 = vcmask 261120   ;;  %v200_v0 = vld [vmem:[%s163_s28] sm:$0xff]  ;;  %v203_v1 = vld [vmem:[%s173_s30] sm:$0xff]  ;;  %s199_s26 = scalar_lea.vmem [#allocation7], %s327_s25  ;;  %s518_s6 = smov 32  }
  0x3a   : > { %202 = vst.msk [vmem:[%s199_s26] sm:$0xff] %vm201_vm0, %v200_v0  ;;  %205 = vrot.lane.b32.xlu0 %v203_v1, %s518_s6  ;;  %s331_s7 = sshll.u32 %s555_s13, 3  ;;  %s223_s17 = sshll.u32 %s199_s26, 4  ;;  %vm208_vm1 = vcmask 523520   ;;  %s224_s17 = int_to_ptr.vmem [resolvable:$true] %s223_s17 }
  0x3b   : > { %s221_s16 = scalar_lea.hbm %s696_s2, %s331_s7  ;;  %s211_s20 = scalar_lea.sflag [#allocation4], %s648_s23 }
  0x3c   : > { %s225_s29 = sshll.u32 %s221_s16, 4  ;;  %s466_s24 = scalar_lea.hbm %s696_s2, 16  ;;  %s226_s29 = int_to_ptr.hbm [resolvable:$true] %s225_s29 }
  0x3d   : > { %s460_s3 = sshra.s32 %s226_s29, 4  ;;  %s461_s3 = int_to_ptr.hbm [resolvable:$true] %s460_s3 }
  0x3e   : > { %s462_s5 = scalar_lea.hbm %s461_s3, 8  ;;  %p467_p10 = scmp.lt.s32.totalorder %s461_s3, %s696_s2 }
  0x3f   : > { %p463_p6 = scmp.ne.s32.totalorder %s461_s3, %s462_s5  ;;  %p468_p2 = scmp.lt.s32.totalorder %s466_s24, %s462_s5 }
  0x41   : > { %p464_p13 = pnand %p463_p6, %p584_p11  ;;  %p469_p9 = por %p468_p2, %p467_p10 }
  0x43   : > { %p465_p3 = pneg %p464_p13 }
  0x45   : > { %p470_p0 = pnand %p469_p9, %p465_p3 }
  0xac   : > { %v206_v2 = vpop.permute.xlu0 %205 }
  0xad   : > { %209 = vst.msk [vmem:[%s199_s26] sm:$0xff] %vm208_vm1, %v206_v2 }
  0xae   : > { %473 = shalt.err (!%p470_p0)
}
  0xaf   : > { %338 = dma.vmem_to_hbm [thread:$0]  (%p584_p11), %s224_s17, 128, %s226_s29, %s211_s20  }
  0xb0 PF: > { %s237_s23 = sand.u32 1, %s504_s9   ;;  %p703_p1 = scmp.ge.s32.totalorder %s516_s12, 2 }
  0xb1   : > { %s238_s28 = scalar_lea.sflag [#allocation4], %s237_s23 }
  0xb2   : > { %p348_p4 = pnand %p703_p1, %p588_p12 }
  0xb4   : > { %p349_p7 = pneg %p348_p4 }
  0xb6   : > { %499 = dma.done.wait (%p349_p7), %s238_s28, 128  }
  0xb7   : > { %501 = vsyncadd (%p349_p7), %s238_s28, 4294967168  ;;  %p18_p5 = scmp.ge.s32.totalorder %s559_s15, 4   ;;  %s704_s9 = smov %s508_s10 }
  0xb8   : > { %s705_s10 = smov %s512_s11  ;;  %s706_s11 = smov %s571_s18 }
  0xb9   : > { %s707_s12 = smov %s559_s15  ;;  %20 = sbr.rel (!%p18_p5) target bundleno = 7 (0x7), region = 86 }
  0xbe   :  { %244 = vsyncpa [#allocation3], 1 }
  0xbf   :  { %246 = vsyncpa [#allocation3 + $0x1], 1 }
  0xc0   :  { %247 = vsyncpa [#allocation6], 1 }
  0xc1   :  { %249 = vsyncpa [#allocation6 + $0x1], 1 }
  0xc2   :  { %250 = vsyncpa [#allocation4], 1 }
  0xc3   :  { %252 = vsyncpa [#allocation4 + $0x1], 1 }

</bundles_post_ra>
